<compile_context>
chip_gen: v7x
topology: tpu7x:2x2x1
jax: 0.10.0
libtpu: 0.0.40
codegen_flags: <defaults>
</compile_context>

<pallas_src>
import functools

import jax
import jax.numpy as jnp
from jax import lax
from jax.experimental import pallas as pl
from jax.experimental.pallas import tpu as pltpu


def _self_attention_kernel(x_ref, mqk_ref, wv_ref, gamma_ref, o_ref, *,
                           tj, compute_dtype, approx_recip):
    # x_ref : (1, C, N) full block, resident across the column-tile grid axis.
    col0 = pl.multiple_of(pl.program_id(1) * tj, tj)
    x = x_ref[0]                                      # (C, N)
    xj = x_ref[0, :, pl.ds(col0, tj)]                 # (C, TJ) this step's cols
    xc = x.astype(compute_dtype)
    xjc = xj.astype(compute_dtype)

    # Fused q/k projection for this column tile: qk = (wq^T wk) @ x[:, cols].
    qk = jnp.dot(mqk_ref[...], xjc,
                 preferred_element_type=jnp.float32)              # (C, TJ)

    # scores[i, t] = sum_c x[c, i] * qk[c, t]  ==  (f^T g)[i, cols[t]]
    scores = lax.dot_general(
        xc, qk.astype(compute_dtype), (((0,), (0,)), ((), ())),
        preferred_element_type=jnp.float32)                       # (N, TJ)

    # Unnormalized softmax over axis 0 (== F.softmax(.., dim=1) on (B, N, N)).
    # Normalization is deferred past the MXU: C*TJ multiplies, not N*TJ.
    m = jnp.max(scores, axis=0, keepdims=True)
    p = jnp.exp(scores - m)                                       # (N, TJ) f32
    denom = jnp.sum(p, axis=0, keepdims=True)                     # (1, TJ) f32

    # Reassociated value path: h @ beta == wv @ (x @ p) / denom.
    t = jnp.dot(xc, p.astype(compute_dtype),
                preferred_element_type=jnp.float32)               # (C, TJ)
    attn = jnp.dot(wv_ref[...], t.astype(compute_dtype),
                   preferred_element_type=jnp.float32)            # (C, TJ)
    attn = attn * pl.reciprocal(denom, approx=approx_recip)       # bcast over C

    gamma = gamma_ref[0]
    o_ref[0] = (gamma * attn + xj.astype(jnp.float32)).astype(o_ref.dtype)


def _vmem_capacity_bytes():
    try:
        return int(pltpu.get_tpu_info().vmem_capacity_bytes)
    except Exception:
        return 128 << 20   # v5e/v6e default if the query is unavailable


def _pick_tile_j(N, C, xb, vmem_cap):
    """Largest lane-dense column tile whose working set stays well under VMEM."""
    if N <= 512:
        return N
    budget = int(0.40 * vmem_cap)   # leave room for double-buffering & spill slack
    for tj in (2048, 1024, 512, 256, 128):
        if N % tj:
            continue
        need = (2 * C * N * xb            # resident x block (double-buffered)
                + 2 * C * tj * xb         # output tile (double-buffered)
                + 3 * N * tj * 4          # scores / p live simultaneously (f32)
                + 6 * C * tj * 4)         # qk / t / attn temporaries
        if need <= budget:
            return tj
    return 128


def self_attention_pallas(x, wq, wk, wv, gamma, *, tile_j=None,
                          compute_dtype=jnp.bfloat16, approx_recip=True):
    """o = gamma * (wv x) softmax((wq x)^T (wk x), dim=1) + x, fused on TPU."""
    B, C, N = x.shape
    xb = x.dtype.itemsize
    wb = jnp.dtype(compute_dtype).itemsize
    vmem_cap = _vmem_capacity_bytes()

    if tile_j is None:
        tile_j = _pick_tile_j(N, C, xb, vmem_cap)
    assert N % tile_j == 0, "N must be divisible by the column tile"
    assert tile_j == N or tile_j % 128 == 0, "column tile must stay lane dense"
    TJ = tile_j
    n_j = N // TJ

    # Algebraic fusion (done once, plain JAX): (wq x)^T (wk x) = x^T (wq^T wk) x
    m_qk = jnp.dot(wq.T, wk).astype(compute_dtype)                # (C, C)
    wv_c = wv.astype(compute_dtype)                               # (C, C)

    kernel = functools.partial(_self_attention_kernel, tj=TJ,
                               compute_dtype=compute_dtype,
                               approx_recip=approx_recip)

    # --- compiler hints ------------------------------------------------------
    vmem_need = (2 * C * N * xb                      # resident x block
                 + 2 * C * TJ * xb                   # output tile
                 + 4 * C * C * wb                    # weight blocks
                 + 3 * N * TJ * 4                    # scores / p (f32)
                 + 6 * C * TJ * 4)                   # qk / t / attn (f32)
    vmem_limit = int(min(0.80 * vmem_cap, max(32 << 20, 2 * vmem_need)))
    flops = B * (2 * C * C * N                       # fused q/k projection
                 + 2 * C * C * N                     # wv @ (x @ p)
                 + 2 * C * N * N                     # score matmul
                 + 2 * C * N * N)                    # x @ p
    bytes_accessed = 2 * B * C * N * xb + 2 * C * C * wb + 4
    cost = pl.CostEstimate(flops=int(flops), transcendentals=int(B * N * N),
                           bytes_accessed=int(bytes_accessed))

    return pl.pallas_call(
        kernel,
        out_shape=jax.ShapeDtypeStruct((B, C, N), x.dtype),
        grid_spec=pltpu.PrefetchScalarGridSpec(
            num_scalar_prefetch=0,
            grid=(B, n_j),
            in_specs=[
                pl.BlockSpec((1, C, N), lambda b, j: (b, 0, 0)),    # x (full)
                pl.BlockSpec((C, C), lambda b, j: (0, 0)),          # wq^T wk
                pl.BlockSpec((C, C), lambda b, j: (0, 0)),          # wv
                pl.BlockSpec(memory_space=pltpu.MemorySpace.SMEM),  # gamma
            ],
            out_specs=pl.BlockSpec((1, C, TJ), lambda b, j: (b, 0, j)),
        ),
        compiler_params=pltpu.CompilerParams(
            dimension_semantics=("parallel", "parallel"),
            vmem_limit_bytes=vmem_limit),
        cost_estimate=cost,
    )(x, m_qk, wv_c, gamma)


# ---------------- parameter setup & references (glue, plain JAX) -------------

def _kaiming_spectral_weight(key, out_ch, in_ch):
    # nn.init.kaiming_normal_ on Conv1d weight (out, in, 1): std = sqrt(2/in).
    w = jax.random.normal(key, (out_ch, in_ch), jnp.float32) * jnp.sqrt(2.0 / in_ch)
    # spectral_norm: divide by the largest singular value (converged value of
    # PyTorch's power iteration).
    sigma = jnp.linalg.svd(w, compute_uv=False)[0]
    return w / sigma


def _reference(x, wq, wk, wv, gamma):
    # Straight transcription of the PyTorch forward (f32).
    f = jnp.einsum("oc,bcn->bon", wq, x)
    g = jnp.einsum("oc,bcn->bon", wk, x)
    h = jnp.einsum("oc,bcn->bon", wv, x)
    scores = jnp.einsum("bci,bcj->bij", f, g)          # (B, N, N)
    beta = jax.nn.softmax(scores, axis=1)              # dim=1
    return gamma[0] * jnp.einsum("bcn,bnm->bcm", h, beta) + x


def _reference_matched(x, wq, wk, wv, gamma, compute_dtype):
    # Precision-matched reference for the bf16 MXU path (same casts / same
    # reassociation as the kernel; softmax math in f32).
    m_qk = jnp.dot(wq.T, wk).astype(compute_dtype)
    wv_c = wv.astype(compute_dtype)
    xc = x.astype(compute_dtype)
    qk = jnp.einsum("oc,bcn->bon", m_qk, xc,
                    preferred_element_type=jnp.float32).astype(compute_dtype)
    scores = jnp.einsum("bci,bcj->bij", xc, qk,
                        preferred_element_type=jnp.float32)       # (B, N, N)
    m = scores.max(axis=1, keepdims=True)
    p = jnp.exp(scores - m)
    denom = p.sum(axis=1, keepdims=True)                          # (B, 1, N)
    t = jnp.einsum("bcn,bnm->bcm", xc, p.astype(compute_dtype),
                   preferred_element_type=jnp.float32)
    attn = jnp.einsum("oc,bcm->bom", wv_c, t.astype(compute_dtype),
                      preferred_element_type=jnp.float32)
    attn = attn / denom
    return gamma[0] * attn + x


if __name__ == "__main__":
    B, C, N = 2, 16, 256
    C8 = C // 8

    key = jax.random.PRNGKey(0)
    kx, kq, kk, kv = jax.random.split(key, 4)

    x = jax.random.normal(kx, (B, C, N), jnp.float32)
    wq = _kaiming_spectral_weight(kq, C8, C)
    wk = _kaiming_spectral_weight(kk, C8, C)
    wv = _kaiming_spectral_weight(kv, C, C)

    # gamma = 0 (the module's init): output is exactly the residual.
    gamma0 = jnp.array([0.0], jnp.float32)
    out0 = jax.block_until_ready(self_attention_pallas(x, wq, wk, wv, gamma0))
    assert out0.shape == (B, C, N)
    assert jnp.allclose(out0, x, atol=1e-6)

    # Exact f32 path (2 column tiles per batch element) vs. the straight
    # PyTorch-semantics reference.
    gamma1 = jnp.array([0.7], jnp.float32)
    out1 = jax.block_until_ready(
        self_attention_pallas(x, wq, wk, wv, gamma1, tile_j=128,
                              compute_dtype=jnp.float32, approx_recip=False))
    ref1 = _reference(x, wq, wk, wv, gamma1)
    assert jnp.allclose(out1, ref1, atol=2e-3, rtol=2e-3)

    # Default fast path: bf16 MXU operands + approx reciprocal, checked against
    # a precision-matched pure-JAX reference.
    out2 = jax.block_until_ready(
        self_attention_pallas(x, wq, wk, wv, gamma1, tile_j=128))
    ref2 = _reference_matched(x, wq, wk, wv, gamma1, jnp.bfloat16)
    assert jnp.allclose(out2, ref2, atol=2e-2, rtol=2e-2)

    print("KERNEL_OK")
</pallas_src>

<mosaic_0001>
module attributes {stable_mosaic.version = 11 : i64} {
  func.func @_self_attention_kernel(%arg0: i32, %arg1: i32, %arg2: memref<1x16x256xf32, #tpu.memory_space<vmem>>, %arg3: memref<16x16xbf16, #tpu.memory_space<vmem>>, %arg4: memref<16x16xbf16, #tpu.memory_space<vmem>>, %arg5: memref<1xf32, #tpu.memory_space<smem>>, %arg6: memref<1x16x256xf32, #tpu.memory_space<vmem>>) attributes {dimension_semantics = [#tpu.dimension_semantics<parallel>, #tpu.dimension_semantics<parallel>], iteration_bounds = array<i64: 2, 1>, scalar_prefetch = 0 : i64, scratch_operands = 0 : i64, tpu.core_type = #tpu.core_type<tc>, window_params = [{transform_indices = @transform_0, window_bounds = array<i64: 1, 16, 256>}, {pipeline_mode = #tpu.pipeline_mode<synchronous>, transform_indices = @transform_1, window_bounds = array<i64: 16, 16>}, {pipeline_mode = #tpu.pipeline_mode<synchronous>, transform_indices = @transform_2, window_bounds = array<i64: 16, 16>}, {transform_indices = @transform_3, window_bounds = array<i64: 1>}, {transform_indices = @transform_4, window_bounds = array<i64: 1, 16, 256>}]} {
    %c256_i32 = arith.constant 256 : i32
    %0 = arith.muli %arg1, %c256_i32 : i32
    %1 = tpu.assume_multiple %0, 256 : i32
    %c0 = arith.constant 0 : index
    %c0_0 = arith.constant 0 : index
    %c0_1 = arith.constant 0 : index
    %2 = vector.load %arg2[%c0, %c0_0, %c0_1] : memref<1x16x256xf32, #tpu.memory_space<vmem>>, vector<1x16x256xf32>
    %3 = vector.shape_cast %2 : vector<1x16x256xf32> to vector<16x256xf32>
    %c0_2 = arith.constant 0 : index
    %c0_3 = arith.constant 0 : index
    %4 = arith.index_cast %1 : i32 to index
    %5 = vector.load %arg2[%c0_2, %c0_3, %4] : memref<1x16x256xf32, #tpu.memory_space<vmem>>, vector<1x16x256xf32>
    %6 = vector.shape_cast %5 : vector<1x16x256xf32> to vector<16x256xf32>
    %7 = arith.truncf %3 : vector<16x256xf32> to vector<16x256xbf16>
    %8 = arith.truncf %6 : vector<16x256xf32> to vector<16x256xbf16>
    %c0_4 = arith.constant 0 : index
    %c0_5 = arith.constant 0 : index
    %9 = vector.load %arg3[%c0_4, %c0_5] : memref<16x16xbf16, #tpu.memory_space<vmem>>, vector<16x16xbf16>
    %cst = arith.constant dense<0.000000e+00> : vector<16x256xf32>
    %10 = tpu.matmul %9, %8, %cst {dimension_numbers = #tpu.dot_dimension_numbers<[1], [0], [0], [1], [0, 0, 1, 1], [], []>} : vector<16x16xbf16>, vector<16x256xbf16>, vector<16x256xf32> -> vector<16x256xf32>
    %11 = arith.truncf %10 : vector<16x256xf32> to vector<16x256xbf16>
    %cst_6 = arith.constant dense<0.000000e+00> : vector<256x256xf32>
    %12 = tpu.matmul %7, %11, %cst_6 {dimension_numbers = #tpu.dot_dimension_numbers<[0], [0], [1], [1], [0, 1, 1, 1], [], []>} : vector<16x256xbf16>, vector<16x256xbf16>, vector<256x256xf32> -> vector<256x256xf32>
    %cst_7 = arith.constant dense<0xFF800000> : vector<256xf32>
    %13 = vector.multi_reduction <maximumf>, %12, %cst_7 [0] : vector<256x256xf32> to vector<256xf32>
    %14 = vector.shape_cast %13 : vector<256xf32> to vector<1x256xf32>
    %15 = vector.broadcast %14 : vector<1x256xf32> to vector<256x256xf32>
    %16 = arith.subf %12, %15 : vector<256x256xf32>
    %17 = math.exp %16 : vector<256x256xf32>
    %cst_8 = arith.constant dense<0.000000e+00> : vector<256xf32>
    %18 = vector.multi_reduction <add>, %17, %cst_8 [0] : vector<256x256xf32> to vector<256xf32>
    %19 = vector.shape_cast %18 : vector<256xf32> to vector<1x256xf32>
    %20 = arith.truncf %17 : vector<256x256xf32> to vector<256x256xbf16>
    %cst_9 = arith.constant dense<0.000000e+00> : vector<16x256xf32>
    %21 = tpu.matmul %7, %20, %cst_9 {dimension_numbers = #tpu.dot_dimension_numbers<[1], [0], [0], [1], [0, 0, 1, 1], [], []>} : vector<16x256xbf16>, vector<256x256xbf16>, vector<16x256xf32> -> vector<16x256xf32>
    %c0_10 = arith.constant 0 : index
    %c0_11 = arith.constant 0 : index
    %22 = vector.load %arg4[%c0_10, %c0_11] : memref<16x16xbf16, #tpu.memory_space<vmem>>, vector<16x16xbf16>
    %23 = arith.truncf %21 : vector<16x256xf32> to vector<16x256xbf16>
    %cst_12 = arith.constant dense<0.000000e+00> : vector<16x256xf32>
    %24 = tpu.matmul %22, %23, %cst_12 {dimension_numbers = #tpu.dot_dimension_numbers<[1], [0], [0], [1], [0, 0, 1, 1], [], []>} : vector<16x16xbf16>, vector<16x256xbf16>, vector<16x256xf32> -> vector<16x256xf32>
    %25 = tpu.reciprocal %19 {approx = true} : vector<1x256xf32> -> vector<1x256xf32>
    %26 = vector.broadcast %25 : vector<1x256xf32> to vector<16x256xf32>
    %27 = arith.mulf %24, %26 : vector<16x256xf32>
    %c0_13 = arith.constant 0 : index
    %28 = memref.load %arg5[%c0_13] : memref<1xf32, #tpu.memory_space<smem>>
    %29 = vector.broadcast %28 : f32 to vector<16x256xf32>
    %30 = arith.mulf %29, %27 : vector<16x256xf32>
    %31 = arith.addf %30, %6 : vector<16x256xf32>
    %c0_14 = arith.constant 0 : index
    %c0_15 = arith.constant 0 : index
    %c0_16 = arith.constant 0 : index
    %32 = vector.load %arg6[%c0_14, %c0_15, %c0_16] : memref<1x16x256xf32, #tpu.memory_space<vmem>>, vector<1x16x256xf32>
    %33 = vector.shape_cast %32 : vector<1x16x256xf32> to vector<16x256xf32>
    %34 = vector.shape_cast %31 : vector<16x256xf32> to vector<1x16x256xf32>
    tpu.vector_store %arg6[%c0_14, %c0_15, %c0_16], %34 {strides = array<i32>} : memref<1x16x256xf32, #tpu.memory_space<vmem>>, vector<1x16x256xf32>,
    return
  }
  func.func @transform_0(%arg0: i32, %arg1: i32) -> (i32, i32, i32) {
    %c0_i32 = arith.constant 0 : i32
    %c0_i32_0 = arith.constant 0 : i32
    %c0_i32_1 = arith.constant 0 : i32
    return %arg0, %c0_i32, %c0_i32_0 : i32, i32, i32
  }
  func.func @transform_1(%arg0: i32, %arg1: i32) -> (i32, i32) {
    %c0_i32 = arith.constant 0 : i32
    %c0_i32_0 = arith.constant 0 : i32
    %c0_i32_1 = arith.constant 0 : i32
    return %c0_i32, %c0_i32_0 : i32, i32
  }
  func.func @transform_2(%arg0: i32, %arg1: i32) -> (i32, i32) {
    %c0_i32 = arith.constant 0 : i32
    %c0_i32_0 = arith.constant 0 : i32
    %c0_i32_1 = arith.constant 0 : i32
    return %c0_i32, %c0_i32_0 : i32, i32
  }
  func.func @transform_3(%arg0: i32, %arg1: i32) -> i32 {
    %c0_i32 = arith.constant 0 : i32
    %c0_i32_0 = arith.constant 0 : i32
    return %c0_i32 : i32
  }
  func.func @transform_4(%arg0: i32, %arg1: i32) -> (i32, i32, i32) {
    %c0_i32 = arith.constant 0 : i32
    %c0_i32_0 = arith.constant 0 : i32
    return %arg0, %c0_i32, %arg1 : i32, i32, i32
  }
}

</mosaic_0001>

<bundles_post_ra>
// kernel: tpu_custom_call.1
= control target key start
LH: loop header
LB: loop body
LE: loop exit
PB: predicated region body
PF: predicated region fallthrough
CT: control target
= control target key end

     0   :  { %s2543_s0 = inlined_call_operand.hbm [shape: f32[2,16,256], index: 0, kind: input, shape index: {}]   ;;  %s2544_s1 = inlined_call_operand.hbm [shape: bf16[16,16], index: 1, kind: input, shape index: {}]   ;;  %s2545_s2 = inlined_call_operand.vmem [shape: bf16[16,16], index: 2, kind: input, shape index: {}]   ;;  %s2546_s3 = inlined_call_operand.<no memory space> [shape: f32[1], index: 3, kind: input, shape index: {}]   ;;  %s2547_s4 = inlined_call_operand.hbm [shape: f32[2,16,256], index: 4, kind: output, shape index: {}]  }
   0x1   :  { %9 = sst [smem:[#allocation2]] %s2546_s3 }
   0x2   :  { %10 = vsyncpa [#allocation4], 0 }
   0x3   :  { %12 = vsyncpa [#allocation4 + $0x1], 0 }
   0x4   :  { %13 = vsyncpa [#allocation7], 0 }
   0x5   :  { %14 = vsyncpa [#allocation5], 0 }
   0x6   :  { %16 = vsyncpa [#allocation5 + $0x1], 0  ;;  %s1637_s17 = smov 0   ;;  %s1639_s18 = smov 0  }
   0x7   :  { %s1641_s19 = smov 0   ;;  %s1643_s20 = smov 0  }
   0x8   :  { %s1645_s21 = smov 0   ;;  %s1647_s22 = smov 0  }
   0x9 LB: > { %s1196_s3 = sadd.s32 4294967295, %s1597_s22   ;;  %s1197_s23 = sadd.s32 4294967294, %s1597_s22   ;;  %s1597_s22 = sphi %s1647_s22, %s22_s22   ;;  %s1593_s21 = sphi %s1645_s21, %s2720_s21   ;;  %s1589_s20 = sphi %s1643_s20, %s2719_s20   ;;  %s1585_s19 = sphi %s1641_s19, %s2718_s19   ;;  %s1581_s18 = sphi %s1639_s18, %s2717_s18   ;;  %s1577_s17 = sphi %s1637_s17, %s2716_s17  }
   0xa   : > { %p54_p0 = scmp.ne.s32.totalorder %s1581_s18, %s1577_s17  ;;  %p1671_p1 = scmp.eq.s32.totalorder %s1196_s3, 0 }
   0xb   : > { %p1675_p2 = scmp.eq.s32.totalorder %s1196_s3, 1  ;;  %p149_p3 = scmp.eq.s32.totalorder %s1197_s23, 1 }
   0xc   : > { %s2596_s24 = scalar_select %p1671_p1, 1, 0 }
   0xd   : > { %s2597_s25 = scalar_select %p1675_p2, 1, 0 }
   0xe   : > { %p1681_p4 = por %p1671_p1, %p54_p0  ;;  %p1198_p5 = scmp.ge.s32.totalorder %s1597_s22, 1 }
   0xf   : > { %p1686_p6 = por %p149_p3, %p54_p0  ;;  %p156_p7 = scmp.lt.s32.totalorder %s1597_s22, 3 }
  0x10   : > { %s2598_s26 = scalar_select %p1681_p4, 1, 0 }
  0x11   : > { %s2599_s27 = scalar_select %p1686_p6, 1, 0 }
  0x12   : > { %p1691_p8 = pnand %p1198_p5, %p156_p7  ;;  %s1599_s29 = smov [#allocation6]  }
  0x13   : > { %s168_s30 = sshll.u32 %s1599_s29, 4  ;;  %s34_s6 = sadd.s32 1, %s1593_s21  ;;  %s169_s30 = int_to_ptr.vmem [resolvable:$true] %s168_s30 }
  0x14   : > { %s2600_s28 = scalar_select %p1691_p8, 1, 0 }
  0x15   : > { %p1243_p9 = pneg %p1691_p8  ;;  %s1453_s9 = scalar_lea.hbm %s2544_s1, 128 }
  0x16   : > { %p1454_p12 = scmp.ne.s32.totalorder %s2544_s1, %s1453_s9  ;;  %p1460_p5 = scmp.lt.u32.totalorder %s1453_s9, %s2544_s1 }
  0x17   : > { %p1700_p11 = pnand %p1243_p9, %p1671_p1 }
  0x19   : > { %p1455_p13 = pneg %p1700_p11 }
  0x1b   : > { %p1456_p0 = pnand %p1455_p13, %p1454_p12 }
  0x1d   : > { %p1457_p3 = pneg %p1456_p0 }
  0x1f   : > { %p1462_p7 = pnand %p1460_p5, %p1457_p3 }
  0x21   : > { %1465 = shalt.err (!%p1462_p7)
}
  0x22   : > { %s1466_s14 = scalar_lea.vmem %s169_s30, 128  ;;  %p1474_p1 = scmp.lt.s32.totalorder %s169_s30, %s169_s30 }
  0x23   : > { %p1467_p9 = scmp.ne.s32.totalorder %s169_s30, %s1466_s14  ;;  %p1475_p4 = scmp.lt.s32.totalorder %s1466_s14, %s1466_s14 }
  0x25   : > { %p1469_p10 = pnand %p1467_p9, %p1455_p13  ;;  %p1476_p8 = por %p1475_p4, %p1474_p1 }
  0x27   : > { %p1470_p6 = pneg %p1469_p10 }
  0x29   : > { %p1477_p2 = pnand %p1476_p8, %p1470_p6 }
  0x2b   : > { %1480 = shalt.err (!%p1477_p2)
}
  0x2c   : > { %s1600_s15 = smov 64   ;;  %s1601_s16 = smov 4  }
  0x2d   : > { %1246 = dma.hbm_to_vmem [thread:$0]  (!%p1700_p11), %s2544_s1, 128, %s169_s30, [#allocation7], %s1600_s15, %s1600_s15, %s1601_s16  }
  0x2e   : > { %p36_p1 = scmp.ge.s32.totalorder %s34_s6, 2  ;;  %s41_s29 = sadd.s32 1, %s1585_s19 }
  0x2f   : > { %p48_p2 = scmp.ne.s32.totalorder %s1585_s19, %s1581_s18  ;;  %p49_p4 = scmp.eq.s32.totalorder %s1597_s22, 0 }
  0x30   : > { %s2722_s6 = smov (%p36_p1, %s34_s6), 0  ;;  %p2603_p8 = scmp.ne.s32.totalorder %s2597_s25, 0 }
  0x31   : > { %p1727_p6 = por %p49_p4, %p48_p2  ;;  %s38_s5 = ssub.s32 %s1593_s21, %s2722_s6 }
  0x32   : > { %p1733_p10 = por %p2603_p8, %p48_p2  ;;  %p1256_p12 = scmp.lt.s32.totalorder %s1597_s22, 2 }
  0x33   : > { %p39_p11 = scmp.eq.s32.totalorder %s38_s5, 0  ;;  %s188_s30 = sand.u32 1, %s1585_s19  }
  0x34   : > { %s1201_s9 = sshll.u32 %s188_s30, 5  ;;  %s1233_s11 = sshll.u32 %s1593_s21, 9 }
  0x35   : > { %s1742_s10 = scalar_select %p39_p11, %s1585_s19, %s41_s29  }
  0x36   : > { %s1748_s14 = scalar_lea.hbm %s2543_s0, %s1233_s11  ;;  %s192_s25 = scalar_lea.vmem [#allocation3], %s1201_s9 }
  0x37   : > { %s199_s15 = sshll.u32 %s192_s25, 4  ;;  %p1754_p13 = pnand %p1256_p12, %p1727_p6  ;;  %s1750_s15 = int_to_ptr.vmem [resolvable:$true] %s199_s15 }
  0x38   : > { %s1758_s3 = scalar_lea.sflag [#allocation4], %s188_s30  ;;  %s1481_s23 = scalar_lea.hbm %s1748_s14, 512 }
  0x39   : > { %p1482_p0 = scmp.ne.s32.totalorder %s1748_s14, %s1481_s23  ;;  %p1483_p3 = pneg %p1754_p13 }
  0x3a   : > { %s1486_s7 = scalar_lea.hbm %s2543_s0, 1024  ;;  %p1487_p9 = scmp.lt.u32.totalorder %s1748_s14, %s2543_s0 }
  0x3b   : > { %p1484_p5 = pnand %p1483_p3, %p1482_p0  ;;  %p1488_p1 = scmp.lt.u32.totalorder %s1486_s7, %s1481_s23 }
  0x3c   : > { %p1490_p4 = scmp.lt.u32.totalorder %s1481_s23, %s1748_s14 }
  0x3d   : > { %p1485_p7 = pneg %p1484_p5  ;;  %p1489_p2 = por %p1488_p1, %p1487_p9 }
  0x3f   : > { %p1491_p6 = por %p1490_p4, %p1489_p2 }
  0x41   : > { %p1492_p8 = pnand %p1491_p6, %p1485_p7 }
  0x43   : > { %1495 = shalt.err (!%p1492_p8)
}
  0x44   : > { %s1496_s30 = scalar_lea.vmem %s1750_s15, 512  ;;  %s1602_s12 = smov [#allocation3]  }
  0x45   : > { %p1497_p12 = scmp.ne.s32.totalorder %s1750_s15, %s1496_s30  ;;  %s1501_s13 = sshll.u32 %s1602_s12, 4  ;;  %s1502_s13 = int_to_ptr.vmem [resolvable:$false] %s1501_s13 }
  0x46   : > { %s1503_s25 = scalar_lea.vmem %s1502_s13, 1024  ;;  %p1504_p5 = scmp.lt.s32.totalorder %s1750_s15, %s1502_s13 }
  0x47   : > { %p1499_p11 = pnand %p1497_p12, %p1483_p3  ;;  %p1505_p9 = scmp.lt.s32.totalorder %s1503_s25, %s1496_s30 }
  0x49   : > { %p1500_p0 = pneg %p1499_p11  ;;  %p1506_p1 = por %p1505_p9, %p1504_p5 }
  0x4b   : > { %p1507_p2 = pnand %p1506_p1, %p1500_p0 }
  0x4d   : > { %1510 = shalt.err (!%p1507_p2)
}
  0x4e   : > { %s1603_s23 = smov 256   ;;  %s1604_s29 = smov 16  }
  0x4f   : > { %1250 = dma.hbm_to_vmem [thread:$0]  (!%p1754_p13), %s1748_s14, 512, %s1750_s15, %s1758_s3, %s1603_s23, %s1603_s23, %s1604_s29  }
  0x50   : > { %p2606_p3 = scmp.ne.s32.totalorder %s2600_s28, 0 }
  0x52   : > { %211 = sbr.rel (%p2606_p3) target bundleno = 1252 (0x4e4), region = 36 }
  0x59   : > { %s1789_s5 = sand.u32 1, %s1581_s18   ;;  %p2607_p7 = scmp.ne.s32.totalorder %s2598_s26, 0 }
  0x5a   : > { %s1205_s7 = sshll.u32 %s1789_s5, 5  ;;  %s214_s9 = scalar_lea.sflag [#allocation4], %s1789_s5 }
  0x5b   : > { %s1795_s11 = scalar_lea.vmem [#allocation3], %s1205_s7 }
  0x5c   : > { %1564 = dma.done.wait (%p2607_p7), %s214_s9, 512  }
  0x5d   : > { %1566 = vsyncadd (%p2607_p7), %s214_s9, 4294966784  ;;  %p2608_p13 = scmp.ne.s32.totalorder %s2596_s24, 0 }
  0x5f   : > { %1568 = dma.done.wait (%p2608_p13), [#allocation7], 128  }
  0x60   : > { %1570 = vsyncadd (%p2608_p13), [#allocation7], 4294967168  ;;  %v2552_v0 = vmov 0   ;;  %v258_v1 = vld [vmem:[%s1795_s11 + $0x8] sm:$0xff]  ;;  %v260_v2 = vld [vmem:[%s1795_s11 + $0x18] sm:$0xff]  ;;  %vm272_vm0 = vcmask 130048  }
  0x61   : > { %308 = vmatprep.mubr.bf16.mxu0 %v2552_v0  ;;  %433 = vmatprep.mubr.bf16.mxu1 %v2552_v0  ;;  %v257_v3 = vld [vmem:[%s1795_s11] sm:$0xff]  ;;  %v264_v4 = vpack.c.bf16 %v260_v2, %v258_v1  ;;  %v259_v5 = vld [vmem:[%s1795_s11 + $0x10] sm:$0xff]  ;;  %s1070_s28 = sld [smem:[#allocation2]]  ;;  %s245_s14 = scalar_lea.vmem [#allocation8], %s1205_s7 }
  0x62   : > { %v1811_v6 = vpack.c.bf16 %v259_v5, %v257_v3  ;;  %v1315_v7 = vld [vmem:[#allocation6] sm:$0xff]   ;;  %s1100_s15 = sshll.u32 %s245_s14, 4  ;;  %s1234_s16 = sshll.u32 %s1589_s20, 9  ;;  %s2486_s15 = int_to_ptr.vmem [resolvable:$true] %s1100_s15 }
  0x63   : > { %276 = vmatprep.subr.bf16.mxu0 %v264_v4  ;;  %s2493_s20 = scalar_lea.hbm %s2547_s4, %s1234_s16  ;;  %s1085_s12 = scalar_lea.sflag [#allocation5], %s1789_s5 }
  0x64   : > { %2609 = vst [vmem:[#allocation12_spill] sm:$0xff] %v1811_v6  ;;  %277 = vmatpush1.bf16.msra.mxu0 %v1811_v6  ;;  %321 = vxpose.xlu0.c.b16.start.end [1/1] (short) %v1811_v6, 128  ;;  %s1511_s13 = scalar_lea.vmem %s2486_s15, 512  ;;  %s1606_s25 = smov [#allocation8]  }
  0x65   : > { %p1512_p4 = scmp.ne.s32.totalorder %s2486_s15, %s1511_s13  ;;  %s1515_s23 = sshll.u32 %s1606_s25, 4  ;;  %s1516_s23 = int_to_ptr.vmem [resolvable:$false] %s1515_s23 }
  0x66   : > { %s1517_s29 = scalar_lea.vmem %s1516_s23, 1024  ;;  %p1518_p12 = scmp.lt.s32.totalorder %s2486_s15, %s1516_s23 }
  0x67   : > { %1209 = vmatmul.mubr.msk.bf16.vlgmr.msra.gmra.mrb[0].mxu0 %vm272_vm0, %v1315_v7  ;;  %p1513_p6 = pnand %p1512_p4, %p1733_p10  ;;  %p1519_p11 = scmp.lt.s32.totalorder %s1517_s29, %s1511_s13 }
  0x68   : > { %998 = vmatprep.mubr.bf16.mxu0 %v264_v4 }
  0x69   : > { %p1514_p8 = pneg %p1513_p6  ;;  %p1520_p0 = por %p1519_p11, %p1518_p12 }
  0x6b   : > { %p1521_p5 = pnand %p1520_p0, %p1514_p8 }
  0x81   : > { %337 = vxpose.xlu0.c.b16.start.end [1/1] (short) %v264_v4, 128 }
  0xca   : > { %v329_v14 = vpop.trf.xlu0 }
  0xce   : > { %v330_v15 = vpop.trf.xlu0 }
  0xd2   : > { %v331_v16 = vpop.trf.xlu0 }
  0xd6   : > { %v332_v17 = vpop.trf.xlu0 }
  0xda   : > { %v333_v18 = vpop.trf.xlu0 }
  0xde   : > { %v334_v19 = vpop.trf.xlu0 }
  0xe2   : > { %v335_v20 = vpop.trf.xlu0 }
  0xe6   : > { %v336_v21 = vpop.trf.xlu0 }
  0xea   : > { %v345_v22 = vpop.trf.xlu0 }
  0xee   : > { %v346_v23 = vpop.trf.xlu0 }
  0xf2   : > { %v347_v24 = vpop.trf.xlu0 }
  0xf6   : > { %v348_v25 = vpop.trf.xlu0 }
  0xfa   : > { %v349_v26 = vpop.trf.xlu0 }
  0xfe   : > { %v350_v27 = vpop.trf.xlu0 }
 0x102   : > { %v351_v28 = vpop.trf.xlu0 }
 0x106   : > { %v352_v29 = vpop.trf.xlu0 }
 0x13a   : > { %v310_v8 = vpop.f32.mrb[0].mxu0 }
 0x13b   : > { %v312_v9 = vpop.f32.mrb[1].mxu0 }
 0x13c   : > { %v314_v10 = vpop.f32.mrb[2].mxu0 }
 0x13d   : > { %v319_v11 = vpack.c.bf16 %v314_v10, %v310_v8  ;;  %v316_v12 = vpop.f32.mrb[3].mxu0 }
 0x13e   : > { %v320_v13 = vpack.c.bf16 %v316_v12, %v312_v9 }
 0x140   : > { %401 = vmatprep.subr.bf16.mxu1 %v320_v13 }
 0x141   : > { %402 = vmatpush1.bf16.msra.mxu1 %v319_v11 }
 0x144   : > { %1210 = vmatmul.mubr.msk.bf16.vlgmr.msra.gmra.mrb[0].mxu1 %vm272_vm0, %v329_v14 }
 0x145   : > { %443 = vmatprep.mubr.bf16.mxu1 %v2552_v0 }
 0x14c   : > { %1211 = vmatmul.mubr.msk.bf16.gmra.mrb[4].mxu1 %vm272_vm0, %v330_v15 }
 0x14d   : > { %453 = vmatprep.mubr.bf16.mxu1 %v2552_v0 }
 0x154   : > { %1212 = vmatmul.mubr.msk.bf16.gmra.mrb[8].mxu1 %vm272_vm0, %v331_v16 }
 0x155   : > { %463 = vmatprep.mubr.bf16.mxu1 %v2552_v0 }
 0x15c   : > { %1213 = vmatmul.mubr.msk.bf16.gmra.mrb[12].mxu1 %vm272_vm0, %v332_v17 }
 0x15d   : > { %473 = vmatprep.mubr.bf16.mxu1 %v2552_v0 }
 0x164   : > { %1214 = vmatmul.mubr.msk.bf16.gmra.mrb[16].mxu1 %vm272_vm0, %v333_v18 }
 0x165   : > { %483 = vmatprep.mubr.bf16.mxu1 %v2552_v0 }
 0x16c   : > { %1215 = vmatmul.mubr.msk.bf16.gmra.mrb[20].mxu1 %vm272_vm0, %v334_v19 }
 0x16d   : > { %493 = vmatprep.mubr.bf16.mxu1 %v2552_v0 }
 0x174   : > { %1216 = vmatmul.mubr.msk.bf16.gmra.mrb[24].mxu1 %vm272_vm0, %v335_v20 }
 0x175   : > { %503 = vmatprep.mubr.bf16.mxu1 %v2552_v0 }
 0x17c   : > { %1217 = vmatmul.mubr.msk.bf16.gmra.mrb[28].mxu1 %vm272_vm0, %v336_v21 }
 0x17d   : > { %513 = vmatprep.mubr.bf16.mxu1 %v2552_v0 }
 0x184   : > { %1218 = vmatmul.mubr.msk.bf16.gmra.mrb[32].mxu1 %vm272_vm0, %v345_v22 }
 0x185   : > { %523 = vmatprep.mubr.bf16.mxu1 %v2552_v0 }
 0x18c   : > { %1219 = vmatmul.mubr.msk.bf16.gmra.mrb[36].mxu1 %vm272_vm0, %v346_v23 }
 0x18d   : > { %533 = vmatprep.mubr.bf16.mxu1 %v2552_v0 }
 0x194   : > { %1220 = vmatmul.mubr.msk.bf16.gmra.mrb[40].mxu1 %vm272_vm0, %v347_v24 }
 0x195   : > { %543 = vmatprep.mubr.bf16.mxu1 %v2552_v0 }
 0x19c   : > { %1221 = vmatmul.mubr.msk.bf16.gmra.mrb[44].mxu1 %vm272_vm0, %v348_v25 }
 0x19d   : > { %553 = vmatprep.mubr.bf16.mxu1 %v2552_v0 }
 0x1a4   : > { %1222 = vmatmul.mubr.msk.bf16.gmra.mrb[48].mxu1 %vm272_vm0, %v349_v26 }
 0x1a5   : > { %563 = vmatprep.mubr.bf16.mxu1 %v2552_v0 }
 0x1ac   : > { %1223 = vmatmul.mubr.msk.bf16.gmra.mrb[52].mxu1 %vm272_vm0, %v350_v27 }
 0x1ad   : > { %573 = vmatprep.mubr.bf16.mxu1 %v2552_v0 }
 0x1b4   : > { %1224 = vmatmul.mubr.msk.bf16.gmra.mrb[56].mxu1 %vm272_vm0, %v351_v28 }
 0x1b5   : > { %583 = vmatprep.mubr.bf16.mxu1 %v2552_v0 }
 0x1bc   : > { %1225 = vmatmul.mubr.msk.bf16.gmra.mrb[60].mxu1 %vm272_vm0, %v352_v29 }
 0x217   : > { %v1847_v30 = vpop.f32.mrb[0].mxu1 }
 0x218   : > { %v1849_v31 = vpop.f32.mrb[1].mxu1 }
 0x219   : > { %v1851_v32 = vpop.f32.mrb[2].mxu1 }
 0x21a   : > { %v1853_v33 = vpop.f32.mrb[3].mxu1 }
 0x21f   : > { %v1855_v34 = vpop.f32.mrb[4].mxu1 }
 0x220   : > { %v594_v35 = vmax.f32 %v1847_v30, %v1855_v34  ;;  %v1859_v36 = vpop.f32.mrb[5].mxu1 }
 0x221   : > { %v631_v37 = vmax.f32 %v1849_v31, %v1859_v36  ;;  %v1863_v38 = vpop.f32.mrb[6].mxu1 }
 0x222   : > { %v595_v39 = vmax.f32 %v1851_v32, %v1863_v38  ;;  %v1867_v40 = vpop.f32.mrb[7].mxu1 }
 0x223   : > { %v632_v41 = vmax.f32 %v1853_v33, %v1867_v40 }
 0x227   : > { %v1871_v42 = vpop.f32.mrb[8].mxu1 }
 0x228   : > { %v596_v43 = vmax.f32 %v594_v35, %v1871_v42  ;;  %v1874_v44 = vpop.f32.mrb[9].mxu1 }
 0x229   : > { %v633_v45 = vmax.f32 %v631_v37, %v1874_v44  ;;  %v1877_v46 = vpop.f32.mrb[10].mxu1 }
 0x22a   : > { %v597_v47 = vmax.f32 %v595_v39, %v1877_v46  ;;  %v1880_v48 = vpop.f32.mrb[11].mxu1 }
 0x22b   : > { %v634_v49 = vmax.f32 %v632_v41, %v1880_v48 }
 0x22f   : > { %v1883_v50 = vpop.f32.mrb[12].mxu1 }
 0x230   : > { %v598_v51 = vmax.f32 %v596_v43, %v1883_v50  ;;  %v1886_v52 = vpop.f32.mrb[13].mxu1 }
 0x231   : > { %v635_v53 = vmax.f32 %v633_v45, %v1886_v52  ;;  %v1889_v54 = vpop.f32.mrb[14].mxu1 }
 0x232   : > { %v599_v55 = vmax.f32 %v597_v47, %v1889_v54  ;;  %v1892_v56 = vpop.f32.mrb[15].mxu1 }
 0x233   : > { %v636_v57 = vmax.f32 %v634_v49, %v1892_v56 }
 0x237   : > { %v1895_v58 = vpop.f32.mrb[16].mxu1 }
 0x238   : > { %v600_v59 = vmax.f32 %v598_v51, %v1895_v58  ;;  %v1898_v60 = vpop.f32.mrb[17].mxu1 }
 0x239   : > { %v637_v61 = vmax.f32 %v635_v53, %v1898_v60  ;;  %v1901_v62 = vpop.f32.mrb[18].mxu1 }
 0x23a   : > { %v601_v63 = vmax.f32 %v599_v55, %v1901_v62  ;;  %v1904_v1 = vpop.f32.mrb[19].mxu1 }
 0x23b   : > { %v638_v2 = vmax.f32 %v636_v57, %v1904_v1 }
 0x23f   : > { %v1907_v3 = vpop.f32.mrb[20].mxu1 }
 0x240   : > { %v602_v4 = vmax.f32 %v600_v59, %v1907_v3  ;;  %v1910_v5 = vpop.f32.mrb[21].mxu1 }
 0x241   : > { %v639_v7 = vmax.f32 %v637_v61, %v1910_v5  ;;  %v1913_v8 = vpop.f32.mrb[22].mxu1 }
 0x242   : > { %v603_v9 = vmax.f32 %v601_v63, %v1913_v8  ;;  %v1916_v10 = vpop.f32.mrb[23].mxu1 }
 0x243   : > { %2610 = vst [vmem:[#allocation13_spill] sm:$0xff] %v1916_v10  ;;  %v640_v11 = vmax.f32 %v638_v2, %v1916_v10 }
 0x247   : > { %v1919_v12 = vpop.f32.mrb[24].mxu1 }
 0x248   : > { %v604_v13 = vmax.f32 %v602_v4, %v1919_v12  ;;  %v1922_v14 = vpop.f32.mrb[25].mxu1 }
 0x249   : > { %2611 = vst [vmem:[#allocation14_spill] sm:$0xff] %v1922_v14  ;;  %v641_v15 = vmax.f32 %v639_v7, %v1922_v14  ;;  %v1925_v16 = vpop.f32.mrb[26].mxu1 }
 0x24a   : > { %v605_v17 = vmax.f32 %v603_v9, %v1925_v16  ;;  %v1928_v18 = vpop.f32.mrb[27].mxu1 }
 0x24b   : > { %2612 = vst [vmem:[#allocation15_spill] sm:$0xff] %v1928_v18  ;;  %v642_v19 = vmax.f32 %v640_v11, %v1928_v18 }
 0x24f   : > { %v1931_v20 = vpop.f32.mrb[28].mxu1 }
 0x250   : > { %v606_v21 = vmax.f32 %v604_v13, %v1931_v20  ;;  %v1934_v22 = vpop.f32.mrb[29].mxu1 }
 0x251   : > { %2613 = vst [vmem:[#allocation16_spill] sm:$0xff] %v1934_v22  ;;  %v643_v23 = vmax.f32 %v641_v15, %v1934_v22  ;;  %v1937_v24 = vpop.f32.mrb[30].mxu1 }
 0x252   : > { %v607_v25 = vmax.f32 %v605_v17, %v1937_v24  ;;  %v1940_v26 = vpop.f32.mrb[31].mxu1 }
 0x253   : > { %2614 = vst [vmem:[#allocation17_spill] sm:$0xff] %v1940_v26  ;;  %v644_v27 = vmax.f32 %v642_v19, %v1940_v26 }
 0x257   : > { %v1943_v28 = vpop.f32.mrb[32].mxu1 }
 0x258   : > { %v608_v29 = vmax.f32 %v606_v21, %v1943_v28  ;;  %v1946_v35 = vpop.f32.mrb[33].mxu1 }
 0x259   : > { %2615 = vst [vmem:[#allocation18_spill] sm:$0xff] %v1946_v35  ;;  %v645_v37 = vmax.f32 %v643_v23, %v1946_v35  ;;  %v1949_v39 = vpop.f32.mrb[34].mxu1 }
 0x25a   : > { %v609_v41 = vmax.f32 %v607_v25, %v1949_v39  ;;  %v1952_v43 = vpop.f32.mrb[35].mxu1 }
 0x25b   : > { %2616 = vst [vmem:[#allocation19_spill] sm:$0xff] %v1952_v43  ;;  %v646_v45 = vmax.f32 %v644_v27, %v1952_v43 }
 0x25f   : > { %v1955_v47 = vpop.f32.mrb[36].mxu1 }
 0x260   : > { %v610_v49 = vmax.f32 %v608_v29, %v1955_v47  ;;  %v1958_v51 = vpop.f32.mrb[37].mxu1 }
 0x261   : > { %2617 = vst [vmem:[#allocation20_spill] sm:$0xff] %v1958_v51  ;;  %v647_v53 = vmax.f32 %v645_v37, %v1958_v51  ;;  %v1961_v55 = vpop.f32.mrb[38].mxu1 }
 0x262   : > { %v611_v57 = vmax.f32 %v609_v41, %v1961_v55  ;;  %v1964_v59 = vpop.f32.mrb[39].mxu1 }
 0x263   : > { %2618 = vst [vmem:[#allocation21_spill] sm:$0xff] %v1964_v59  ;;  %v648_v61 = vmax.f32 %v646_v45, %v1964_v59 }
 0x267   : > { %v1967_v63 = vpop.f32.mrb[40].mxu1 }
 0x268   : > { %v612_v2 = vmax.f32 %v610_v49, %v1967_v63  ;;  %v1970_v4 = vpop.f32.mrb[41].mxu1 }
 0x269   : > { %2619 = vst [vmem:[#allocation22_spill] sm:$0xff] %v1970_v4  ;;  %v649_v7 = vmax.f32 %v647_v53, %v1970_v4  ;;  %v1973_v9 = vpop.f32.mrb[42].mxu1 }
 0x26a   : > { %v613_v11 = vmax.f32 %v611_v57, %v1973_v9  ;;  %v1976_v13 = vpop.f32.mrb[43].mxu1 }
 0x26b   : > { %2620 = vst [vmem:[#allocation23_spill] sm:$0xff] %v1976_v13  ;;  %v650_v15 = vmax.f32 %v648_v61, %v1976_v13 }
 0x26f   : > { %v1979_v17 = vpop.f32.mrb[44].mxu1 }
 0x270   : > { %v614_v19 = vmax.f32 %v612_v2, %v1979_v17  ;;  %v1982_v21 = vpop.f32.mrb[45].mxu1 }
 0x271   : > { %2621 = vst [vmem:[#allocation24_spill] sm:$0xff] %v1982_v21  ;;  %v651_v23 = vmax.f32 %v649_v7, %v1982_v21  ;;  %v1985_v25 = vpop.f32.mrb[46].mxu1 }
 0x272   : > { %v615_v27 = vmax.f32 %v613_v11, %v1985_v25  ;;  %v1988_v29 = vpop.f32.mrb[47].mxu1 }
 0x273   : > { %2622 = vst [vmem:[#allocation25_spill] sm:$0xff] %v1988_v29  ;;  %v652_v37 = vmax.f32 %v650_v15, %v1988_v29 }
 0x277   : > { %v1991_v41 = vpop.f32.mrb[48].mxu1 }
 0x278   : > { %v616_v45 = vmax.f32 %v614_v19, %v1991_v41  ;;  %v1994_v49 = vpop.f32.mrb[49].mxu1 }
 0x279   : > { %2623 = vst [vmem:[#allocation26_spill] sm:$0xff] %v1994_v49  ;;  %v653_v53 = vmax.f32 %v651_v23, %v1994_v49  ;;  %v1997_v57 = vpop.f32.mrb[50].mxu1 }
 0x27a   : > { %v617_v61 = vmax.f32 %v615_v27, %v1997_v57  ;;  %v2000_v2 = vpop.f32.mrb[51].mxu1 }
 0x27b   : > { %2624 = vst [vmem:[#allocation27_spill] sm:$0xff] %v2000_v2  ;;  %v654_v7 = vmax.f32 %v652_v37, %v2000_v2 }
 0x27f   : > { %v2003_v11 = vpop.f32.mrb[52].mxu1 }
 0x280   : > { %v618_v15 = vmax.f32 %v616_v45, %v2003_v11  ;;  %v2006_v0 = vpop.f32.mrb[53].mxu1 }
 0x281   : > { %2625 = vst [vmem:[#allocation28_spill] sm:$0xff] %v2006_v0  ;;  %v655_v19 = vmax.f32 %v653_v53, %v2006_v0  ;;  %v2009_v6 = vpop.f32.mrb[54].mxu1 }
 0x282   : > { %v619_v23 = vmax.f32 %v617_v61, %v2009_v6  ;;  %v2012_v49 = vpop.f32.mrb[55].mxu1 }
 0x283   : > { %2626 = vst [vmem:[#allocation29_spill] sm:$0xff] %v2012_v49  ;;  %v656_v27 = vmax.f32 %v654_v7, %v2012_v49 }
 0x287   : > { %v2015_v29 = vpop.f32.mrb[56].mxu1 }
 0x288   : > { %v620_v37 = vmax.f32 %v618_v15, %v2015_v29  ;;  %v2018_v2 = vpop.f32.mrb[57].mxu1 }
 0x289   : > { %2627 = vst [vmem:[#allocation30_spill] sm:$0xff] %v2018_v2  ;;  %v657_v45 = vmax.f32 %v655_v19, %v2018_v2  ;;  %v2021_v21 = vpop.f32.mrb[58].mxu1 }
 0x28a   : > { %v621_v53 = vmax.f32 %v619_v23, %v2021_v21  ;;  %v2024_v0 = vpop.f32.mrb[59].mxu1 }
 0x28b   : > { %2628 = vst [vmem:[#allocation31_spill] sm:$0xff] %v2024_v0  ;;  %v658_v61 = vmax.f32 %v656_v27, %v2024_v0 }
 0x28f   : > { %v2027_v13 = vpop.f32.mrb[60].mxu1 }
 0x290   : > { %v622_v7 = vmax.f32 %v620_v37, %v2027_v13  ;;  %v2030_v49 = vpop.f32.mrb[61].mxu1 }
 0x291   : > { %2629 = vst [vmem:[#allocation32_spill] sm:$0xff] %v2030_v49  ;;  %v659_v15 = vmax.f32 %v657_v45, %v2030_v49  ;;  %v2033_v4 = vpop.f32.mrb[62].mxu1 }
 0x292   : > { %v623_v19 = vmax.f32 %v621_v53, %v2033_v4  ;;  %v2036_v2 = vpop.f32.mrb[63].mxu1 }
 0x293   : > { %2630 = vst [vmem:[#allocation33_spill] sm:$0xff] %v2036_v2  ;;  %v660_v23 = vmax.f32 %v658_v61, %v2036_v2 }
 0x294   : > { %v624_v59 = vmax.f32 %v622_v7, %v623_v19 }
 0x295   : > { %v661_v51 = vmax.f32 %v659_v15, %v660_v23 }
 0x296   : > { %v625_v43 = vrot.slane %v624_v59, 4 }
 0x297   : > { %v662_v27 = vrot.slane %v661_v51, 4 }
 0x298   : > { %v626_v0 = vmax.f32 %v624_v59, %v625_v43 }
 0x299   : > { %v663_v35 = vmax.f32 %v661_v51, %v662_v27 }
 0x29a   : > { %v627_v26 = vrot.slane %v626_v0, 2 }
 0x29b   : > { %v664_v37 = vrot.slane %v663_v35, 2 }
 0x29c   : > { %v628_v22 = vmax.f32 %v626_v0, %v627_v26  ;;  %v2650_v26 = vld [vmem:[#allocation32_spill] sm:$0xff] }
 0x29d   : > { %v665_v18 = vmax.f32 %v663_v35, %v664_v37 }
 0x29e   : > { %v629_v14 = vrot.slane %v628_v22, 1 }
 0x29f   : > { %v666_v45 = vrot.slane %v665_v18, 1 }
 0x2a0   : > { %v2039_v49 = vmax.f32 %v628_v22, %v629_v14 }
 0x2a1   : > { %v2041_v10 = vmax.f32 %v665_v18, %v666_v45 }
 0x2a2   : > { %v668_v53 = vsub.f32 %v1847_v30, %v2039_v49  ;;  %v670_v61 = vsub.f32 %v1851_v32, %v2039_v49  ;;  %v672_v43 = vsub.f32 %v1855_v34, %v2039_v49  ;;  %v674_v51 = vsub.f32 %v1863_v38, %v2039_v49 }
 0x2a3   : > { %v676_v0 = vsub.f32 %v1871_v42, %v2039_v49  ;;  %v678_v14 = vsub.f32 %v1877_v46, %v2039_v49  ;;  %v680_v18 = vsub.f32 %v1883_v50, %v2039_v49  ;;  %v682_v30 = vsub.f32 %v1889_v54, %v2039_v49 }
 0x2a4   : > { %v684_v32 = vsub.f32 %v1895_v58, %v2039_v49  ;;  %v686_v34 = vsub.f32 %v1901_v62, %v2039_v49  ;;  %v688_v38 = vsub.f32 %v1907_v3, %v2039_v49  ;;  %v690_v42 = vsub.f32 %v1913_v8, %v2039_v49 }
 0x2a5   : > { %v692_v46 = vsub.f32 %v1919_v12, %v2039_v49  ;;  %v694_v50 = vsub.f32 %v1925_v16, %v2039_v49  ;;  %v696_v54 = vsub.f32 %v1931_v20, %v2039_v49  ;;  %v698_v58 = vsub.f32 %v1937_v24, %v2039_v49 }
 0x2a6   : > { %v700_v62 = vsub.f32 %v1943_v28, %v2039_v49  ;;  %v702_v3 = vsub.f32 %v1949_v39, %v2039_v49  ;;  %v704_v8 = vsub.f32 %v1955_v47, %v2039_v49  ;;  %v706_v12 = vsub.f32 %v1961_v55, %v2039_v49 }
 0x2a7   : > { %v708_v16 = vsub.f32 %v1967_v63, %v2039_v49  ;;  %v710_v20 = vsub.f32 %v1973_v9, %v2039_v49  ;;  %v712_v22 = vsub.f32 %v1979_v17, %v2039_v49  ;;  %v714_v24 = vsub.f32 %v1985_v25, %v2039_v49 }
 0x2a8   : > { %v732_v9 = vmul.f32 1.442695, %v668_v53  ;;  %v736_v17 = vmul.f32 1.442695, %v670_v61  ;;  %v740_v25 = vmul.f32 1.442695, %v672_v43 }
 0x2a9   : > { %v744_v15 = vmul.f32 1.442695, %v674_v51  ;;  %v748_v23 = vmul.f32 1.442695, %v676_v0  ;;  %v752_v27 = vmul.f32 1.442695, %v678_v14 }
 0x2aa   : > { %1317 = vpow2.f32 %v732_v9  ;;  %v756_v37 = vmul.f32 1.442695, %v680_v18  ;;  %v760_v45 = vmul.f32 1.442695, %v682_v30  ;;  %v764_v59 = vmul.f32 1.442695, %v684_v32 }
 0x2ab   : > { %1319 = vpow2.f32 %v736_v17  ;;  %v768_v63 = vmul.f32 1.442695, %v686_v34  ;;  %v772_v53 = vmul.f32 1.442695, %v688_v38  ;;  %v776_v61 = vmul.f32 1.442695, %v690_v42 }
 0x2ac   : > { %1321 = vpow2.f32 %v740_v25  ;;  %v780_v43 = vmul.f32 1.442695, %v692_v46  ;;  %v784_v7 = vmul.f32 1.442695, %v694_v50  ;;  %v788_v51 = vmul.f32 1.442695, %v696_v54 }
 0x2ad   : > { %1323 = vpow2.f32 %v744_v15  ;;  %v792_v55 = vmul.f32 1.442695, %v698_v58  ;;  %v796_v19 = vmul.f32 1.442695, %v700_v62  ;;  %v800_v9 = vmul.f32 1.442695, %v702_v3 }
 0x2ae   : > { %1325 = vpow2.f32 %v748_v23  ;;  %v804_v0 = vmul.f32 1.442695, %v704_v8  ;;  %v808_v14 = vmul.f32 1.442695, %v706_v12  ;;  %v812_v17 = vmul.f32 1.442695, %v708_v16 }
 0x2af   : > { %1327 = vpow2.f32 %v752_v27  ;;  %v2111_v18 = vmul.f32 1.442695, %v710_v20  ;;  %v2113_v30 = vmul.f32 1.442695, %v712_v22  ;;  %v2115_v32 = vmul.f32 1.442695, %v714_v24 }
 0x2b0   : > { %1329 = vpow2.f32 %v756_v37  ;;  %v2631_v16 = vld [vmem:[#allocation13_spill] sm:$0xff]  ;;  %v2633_v25 = vld [vmem:[#allocation15_spill] sm:$0xff]  ;;  %v2634_v27 = vld [vmem:[#allocation16_spill] sm:$0xff] }
 0x2b1   : > { %1331 = vpow2.f32 %v760_v45  ;;  %v2635_v45 = vld [vmem:[#allocation17_spill] sm:$0xff]  ;;  %v2637_v12 = vld [vmem:[#allocation19_spill] sm:$0xff]  ;;  %v2638_v8 = vld [vmem:[#allocation20_spill] sm:$0xff] }
 0x2b2   : > { %1333 = vpow2.f32 %v764_v59  ;;  %v2632_v59 = vld [vmem:[#allocation14_spill] sm:$0xff]  ;;  %v2639_v37 = vld [vmem:[#allocation21_spill] sm:$0xff]  ;;  %v2641_v54 = vld [vmem:[#allocation23_spill] sm:$0xff] }
 0x2b3   : > { %1335 = vpow2.f32 %v768_v63  ;;  %v2640_v58 = vld [vmem:[#allocation22_spill] sm:$0xff]  ;;  %v2642_v15 = vld [vmem:[#allocation24_spill] sm:$0xff]  ;;  %v2643_v42 = vld [vmem:[#allocation25_spill] sm:$0xff] }
 0x2b4   : > { %v2125_v50 = vpop.eup %1317  ;;  %1337 = vpow2.f32 %v772_v53  ;;  %v2644_v53 = vld [vmem:[#allocation26_spill] sm:$0xff]  ;;  %v2645_v34 = vld [vmem:[#allocation27_spill] sm:$0xff] }
 0x2b5   : > { %v2133_v3 = vpop.eup %1319  ;;  %1339 = vpow2.f32 %v776_v61  ;;  %v2636_v61 = vld [vmem:[#allocation18_spill] sm:$0xff] }
 0x2b6   : > { %v2141_v22 = vpop.eup %1321  ;;  %1341 = vpow2.f32 %v780_v43  ;;  %v860_v24 = vadd.f32 %v2133_v3, %v2125_v50  ;;  %v2649_v43 = vld [vmem:[#allocation31_spill] sm:$0xff] }
 0x2b7   : > { %v2149_v23 = vpop.eup %1323  ;;  %1343 = vpow2.f32 %v784_v7  ;;  %v2647_v7 = vld [vmem:[#allocation29_spill] sm:$0xff] }
 0x2b8   : > { %v2157_v20 = vpop.eup %1325  ;;  %1345 = vpow2.f32 %v788_v51  ;;  %v861_v63 = vadd.f32 %v2141_v22, %v860_v24 }
 0x2b9   : > { %v2164_v62 = vpop.eup %1327  ;;  %1347 = vpow2.f32 %v792_v55 }
 0x2ba   : > { %v2172_v46 = vpop.eup %1329  ;;  %1349 = vpow2.f32 %v796_v19  ;;  %v862_v24 = vadd.f32 %v2149_v23, %v861_v63 }
 0x2bb   : > { %v2179_v38 = vpop.eup %1331  ;;  %1351 = vpow2.f32 %v800_v9 }
 0x2bc   : > { %v2187_v39 = vpop.eup %1333  ;;  %1353 = vpow2.f32 %v804_v0  ;;  %v863_v63 = vadd.f32 %v2157_v20, %v862_v24  ;;  %v2651_v24 = vsub.f32 %v1991_v41, %v2039_v49 }
 0x2bd   : > { %v2194_v28 = vpop.eup %1335  ;;  %1355 = vpow2.f32 %v808_v14  ;;  %v2652_v14 = vsub.f32 %v1997_v57, %v2039_v49 }
 0x2be   : > { %v2202_v47 = vpop.eup %1337  ;;  %1357 = vpow2.f32 %v812_v17  ;;  %v828_v55 = vmul.f32 1.442695, %v2651_v24  ;;  %v864_v9 = vadd.f32 %v2164_v62, %v863_v63  ;;  %v2653_v17 = vsub.f32 %v2003_v11, %v2039_v49 }
 0x2bf   : > { %v2208_v35 = vpop.eup %1339  ;;  %1359 = vpow2.f32 %v2111_v18  ;;  %v832_v19 = vmul.f32 1.442695, %v2652_v14  ;;  %v2654_v18 = vsub.f32 %v2009_v6, %v2039_v49  ;;  %v2658_v6 = vsub.f32 %v2027_v13, %v2039_v49 }
 0x2c0   : > { %v2214_v51 = vpop.eup %1341  ;;  %1361 = vpow2.f32 %v2113_v30  ;;  %v836_v0 = vmul.f32 1.442695, %v2653_v17  ;;  %v865_v41 = vadd.f32 %v2172_v46, %v864_v9  ;;  %v2655_v30 = vsub.f32 %v2015_v29, %v2039_v49 }
 0x2c1   : > { %v2221_v24 = vpop.eup %1343  ;;  %1363 = vpow2.f32 %v2115_v32  ;;  %v840_v63 = vmul.f32 1.442695, %v2654_v18  ;;  %v2656_v9 = vsub.f32 %v2021_v21, %v2039_v49 }
 0x2c2   : > { %v2227_v57 = vpop.eup %1345  ;;  %1365 = vpow2.f32 %v828_v55  ;;  %v844_v14 = vmul.f32 1.442695, %v2655_v30  ;;  %v866_v11 = vadd.f32 %v2179_v38, %v865_v41  ;;  %v852_v55 = vmul.f32 1.442695, %v2658_v6 }
 0x2c3   : > { %v2233_v17 = vpop.eup %1347  ;;  %1367 = vpow2.f32 %v832_v19  ;;  %v848_v32 = vmul.f32 1.442695, %v2656_v9  ;;  %v2659_v41 = vsub.f32 %v2033_v4, %v2039_v49  ;;  %v2662_v4 = vsub.f32 %v1859_v36, %v2041_v10 }
 0x2c4   : > { %v2238_v2 = vpop.eup %1349  ;;  %1369 = vpow2.f32 %v836_v0  ;;  %v867_v18 = vadd.f32 %v2187_v39, %v866_v11  ;;  %v2660_v0 = vsub.f32 %v1849_v31, %v2041_v10  ;;  %v2661_v11 = vsub.f32 %v1853_v33, %v2041_v10 }
 0x2c5   : > { %2657 = vst [vmem:[#allocation13_spill] sm:$0xff] %v2238_v2  ;;  %v2244_v29 = vpop.eup %1351  ;;  %1371 = vpow2.f32 %v840_v63  ;;  %v856_v19 = vmul.f32 1.442695, %v2659_v41  ;;  %v742_v49 = vmul.f32 1.442695, %v2662_v4  ;;  %v2663_v31 = vsub.f32 %v1867_v40, %v2041_v10 }
 0x2c6   : > { %v2249_v30 = vpop.eup %1353  ;;  %1373 = vpow2.f32 %v844_v14  ;;  %v868_v21 = vadd.f32 %v2194_v28, %v867_v18  ;;  %v734_v9 = vmul.f32 1.442695, %v2660_v0  ;;  %v738_v63 = vmul.f32 1.442695, %v2661_v11 }
 0x2c7   : > { %v2255_v13 = vpop.eup %1355  ;;  %1375 = vpow2.f32 %v848_v32  ;;  %v746_v18 = vmul.f32 1.442695, %v2663_v31  ;;  %v2664_v32 = vsub.f32 %v1874_v44, %v2041_v10  ;;  %v2665_v33 = vsub.f32 %v1880_v48, %v2041_v10 }
 0x2c8   : > { %v2263_v6 = vpop.eup %1357  ;;  %1377 = vpow2.f32 %v852_v55  ;;  %v869_v14 = vadd.f32 %v2202_v47, %v868_v21  ;;  %v2666_v55 = vsub.f32 %v1886_v52, %v2041_v10  ;;  %v2667_v21 = vsub.f32 %v1892_v56, %v2041_v10 }
 0x2c9   : > { %v750_v41 = vmul.f32 1.442695, %v2664_v32  ;;  %v2272_v0 = vpop.eup %1359  ;;  %1379 = vpow2.f32 %v856_v19  ;;  %v754_v36 = vmul.f32 1.442695, %v2665_v33  ;;  %v2668_v19 = vsub.f32 %v1898_v60, %v2041_v10 }
 0x2ca   : > { %v758_v11 = vmul.f32 1.442695, %v2666_v55  ;;  %v762_v40 = vmul.f32 1.442695, %v2667_v21  ;;  %v2283_v4 = vpop.eup %1361  ;;  %v870_v44 = vadd.f32 %v2208_v35, %v869_v14  ;;  %1381 = vpow2.f32 %v734_v9 }
 0x2cb   : > { %v766_v31 = vmul.f32 1.442695, %v2668_v19  ;;  %v2669_v48 = vsub.f32 %v1904_v1, %v2041_v10  ;;  %v2292_v33 = vpop.eup %1363  ;;  %1383 = vpow2.f32 %v738_v63 }
 0x2cc   : > { %v2300_v14 = vpop.eup %1365  ;;  %v871_v60 = vadd.f32 %v2214_v51, %v870_v44  ;;  %1385 = vpow2.f32 %v742_v49 }
 0x2cd   : > { %v770_v32 = vmul.f32 1.442695, %v2669_v48  ;;  %v2307_v55 = vpop.eup %1367  ;;  %1387 = vpow2.f32 %v746_v18  ;;  %v2670_v18 = vsub.f32 %v1910_v5, %v2041_v10  ;;  %v2671_v48 = vsub.f32 %v2631_v16, %v2041_v10 }
 0x2ce   : > { %v2315_v44 = vpop.eup %1369  ;;  %v872_v49 = vadd.f32 %v2221_v24, %v871_v60  ;;  %1389 = vpow2.f32 %v750_v41 }
 0x2cf   : > { %v2322_v1 = vpop.eup %1371  ;;  %1391 = vpow2.f32 %v754_v36  ;;  %v774_v63 = vmul.f32 1.442695, %v2670_v18  ;;  %v778_v19 = vmul.f32 1.442695, %v2671_v48 }
 0x2d0   : > { %v2330_v60 = vpop.eup %1373  ;;  %v873_v41 = vadd.f32 %v2227_v57, %v872_v49  ;;  %1393 = vpow2.f32 %v758_v11  ;;  %v2672_v11 = vsub.f32 %v2632_v59, %v2041_v10  ;;  %v2677_v59 = vsub.f32 %v2637_v12, %v2041_v10 }
 0x2d1   : > { %v2338_v9 = vpop.eup %1375  ;;  %1395 = vpow2.f32 %v762_v40  ;;  %v2673_v40 = vsub.f32 %v2633_v25, %v2041_v10  ;;  %v2676_v25 = vsub.f32 %v2636_v61, %v2041_v10  ;;  %v2680_v12 = vsub.f32 %v2640_v58, %v2041_v10 }
 0x2d2   : > { %v2343_v21 = vpop.eup %1377  ;;  %v874_v56 = vadd.f32 %v2233_v17, %v873_v41  ;;  %1397 = vpow2.f32 %v766_v31  ;;  %v782_v5 = vmul.f32 1.442695, %v2672_v11  ;;  %v2674_v31 = vsub.f32 %v2634_v27, %v2041_v10 }
 0x2d3   : > { %v2351_v18 = vpop.eup %1379  ;;  %1399 = vpow2.f32 %v770_v32  ;;  %v786_v16 = vmul.f32 1.442695, %v2673_v40  ;;  %v2675_v32 = vsub.f32 %v2635_v45, %v2041_v10  ;;  %v798_v40 = vmul.f32 1.442695, %v2676_v25 }
 0x2d4   : > { %v1382_v48 = vpop.eup %1381  ;;  %v875_v36 = vadd.f32 %v2238_v2, %v874_v56  ;;  %1401 = vpow2.f32 %v774_v63  ;;  %v790_v41 = vmul.f32 1.442695, %v2674_v31  ;;  %v2678_v45 = vsub.f32 %v2638_v8, %v2041_v10 }
 0x2d5   : > { %v1384_v11 = vpop.eup %1383  ;;  %1403 = vpow2.f32 %v778_v19  ;;  %v794_v49 = vmul.f32 1.442695, %v2675_v32  ;;  %v802_v19 = vmul.f32 1.442695, %v2677_v59  ;;  %v814_v59 = vmul.f32 1.442695, %v2680_v12 }
 0x2d6   : > { %v1386_v52 = vpop.eup %1385  ;;  %v876_v56 = vadd.f32 %v2244_v29, %v875_v36  ;;  %1405 = vpow2.f32 %v782_v5  ;;  %v897_v63 = vadd.f32 %v1384_v11, %v1382_v48  ;;  %v935_v27 = vpack.c.bf16 %v1384_v11, %v1382_v48 }
 0x2d7   : > { %v1388_v31 = vpop.eup %1387  ;;  %1407 = vpow2.f32 %v786_v16  ;;  %v806_v32 = vmul.f32 1.442695, %v2678_v45  ;;  %v2679_v16 = vsub.f32 %v2639_v37, %v2041_v10  ;;  %v2681_v8 = vpack.c.bf16 %v2133_v3, %v2125_v50 }
 0x2d8   : > { %v1390_v2 = vpop.eup %1389  ;;  %v877_v61 = vadd.f32 %v2249_v30, %v876_v56  ;;  %1409 = vpow2.f32 %v790_v41  ;;  %v898_v25 = vadd.f32 %v1386_v52, %v897_v63  ;;  %966 = vmatprep.subr.bf16.mxu0 %v935_v27  ;;  %v937_v36 = vpack.c.bf16 %v1388_v31, %v1386_v52 }
 0x2d9   : > { %v1392_v5 = vpop.eup %1391  ;;  %1411 = vpow2.f32 %v794_v49  ;;  %v810_v48 = vmul.f32 1.442695, %v2679_v16  ;;  %967 = vmatpush1.bf16.msra.mxu0 %v2681_v8  ;;  %v2682_v37 = vsub.f32 %v2641_v54, %v2041_v10  ;;  %v2683_v58 = vsub.f32 %v2642_v15, %v2041_v10  ;;  %v2688_v8 = vld [vmem:[#allocation28_spill] sm:$0xff] }
 0x2da   : > { %v1394_v11 = vpop.eup %1393  ;;  %v878_v41 = vadd.f32 %v2255_v13, %v877_v61  ;;  %1413 = vpow2.f32 %v798_v40  ;;  %v899_v56 = vadd.f32 %v1388_v31, %v898_v25  ;;  %968 = vmatprep.subr.bf16.mxu0 %v937_v36  ;;  %v939_v52 = vpack.c.bf16 %v1392_v5, %v1390_v2 }
 0x2db   : > { %v1396_v49 = vpop.eup %1395  ;;  %1415 = vpow2.f32 %v802_v19  ;;  %v818_v63 = vmul.f32 1.442695, %v2682_v37  ;;  %v822_v27 = vmul.f32 1.442695, %v2683_v58  ;;  %v2684_v31 = vsub.f32 %v2643_v42, %v2041_v10 }
 0x2dc   : > { %v1398_v45 = vpop.eup %1397  ;;  %v879_v50 = vadd.f32 %v2263_v6, %v878_v41  ;;  %1417 = vpow2.f32 %v806_v32  ;;  %v900_v3 = vadd.f32 %v1390_v2, %v899_v56  ;;  %v941_v61 = vpack.c.bf16 %v1396_v49, %v1394_v11 }
 0x2dd   : > { %v1400_v40 = vpop.eup %1399  ;;  %1419 = vpow2.f32 %v810_v48  ;;  %v826_v19 = vmul.f32 1.442695, %v2684_v31  ;;  %v2685_v54 = vsub.f32 %v2644_v53, %v2041_v10  ;;  %v2686_v15 = vpack.c.bf16 %v2149_v23, %v2141_v22 }
 0x2de   : > { %v1402_v36 = vpop.eup %1401  ;;  %v880_v16 = vadd.f32 %v2272_v0, %v879_v50  ;;  %1421 = vpow2.f32 %v814_v59  ;;  %v901_v2 = vadd.f32 %v1392_v5, %v900_v3  ;;  %v943_v32 = vpack.c.bf16 %v1400_v40, %v1398_v45 }
 0x2df   : > { %v830_v25 = vmul.f32 1.442695, %v2685_v54  ;;  %969 = vmatpush1.bf16.msra.mxu0 %v2686_v15  ;;  %v1404_v48 = vpop.eup %1403  ;;  %1423 = vpow2.f32 %v818_v63  ;;  %v2687_v42 = vsub.f32 %v2645_v34, %v2041_v10  ;;  %v2689_v53 = vsub.f32 %v2688_v8, %v2041_v10  ;;  %v2691_v63 = vld [vmem:[#allocation30_spill] sm:$0xff] }
 0x2e0   : > { %970 = vmatprep.subr.bf16.mxu0 %v939_v52  ;;  %v1406_v56 = vpop.eup %1405  ;;  %v881_v22 = vadd.f32 %v2283_v4, %v880_v16  ;;  %1425 = vpow2.f32 %v822_v27  ;;  %v902_v23 = vadd.f32 %v1394_v11, %v901_v2  ;;  %v945_v37 = vpack.c.bf16 %v1404_v48, %v1402_v36 }
 0x2e1   : > { %v834_v12 = vmul.f32 1.442695, %v2687_v42  ;;  %v838_v41 = vmul.f32 1.442695, %v2689_v53  ;;  %v1408_v59 = vpop.eup %1407  ;;  %1427 = vpow2.f32 %v826_v19  ;;  %v2690_v5 = vsub.f32 %v2647_v7, %v2041_v10 }
 0x2e2   : > { %v2692_v34 = vsub.f32 %v2691_v63, %v2041_v10  ;;  %v2693_v50 = vpack.c.bf16 %v2164_v62, %v2157_v20  ;;  %v1410_v3 = vpop.eup %1409  ;;  %v882_v31 = vadd.f32 %v2292_v33, %v881_v22  ;;  %1429 = vpow2.f32 %v830_v25 }
 0x2e3   : > { %v842_v52 = vmul.f32 1.442695, %v2690_v5  ;;  %v903_v11 = vadd.f32 %v1396_v49, %v902_v23  ;;  %v947_v27 = vpack.c.bf16 %v1408_v59, %v1406_v56  ;;  %v1412_v19 = vpop.eup %1411  ;;  %1431 = vpow2.f32 %v834_v12  ;;  %v2696_v49 = vld [vmem:[#allocation33_spill] sm:$0xff] }
 0x2e4   : > { %v846_v58 = vmul.f32 1.442695, %v2692_v34  ;;  %971 = vmatpush1.bf16.msra.mxu0 %v2693_v50  ;;  %v2694_v7 = vsub.f32 %v2649_v43, %v2041_v10  ;;  %v2695_v15 = vsub.f32 %v2650_v26, %v2041_v10  ;;  %v1414_v2 = vpop.eup %1413  ;;  %v883_v62 = vadd.f32 %v2300_v14, %v882_v31 }
 0x2e5   : > { %972 = vmatprep.subr.bf16.mxu0 %v941_v61  ;;  %1433 = vpow2.f32 %v838_v41  ;;  %v904_v20 = vadd.f32 %v1398_v45, %v903_v11  ;;  %v949_v42 = vpack.c.bf16 %v1412_v19, %v1410_v3  ;;  %v1416_v25 = vpop.eup %1415  ;;  %v2697_v61 = vsub.f32 %v2696_v49, %v2041_v10 }
 0x2e6   : > { %v850_v54 = vmul.f32 1.442695, %v2694_v7  ;;  %v854_v16 = vmul.f32 1.442695, %v2695_v15  ;;  %1435 = vpow2.f32 %v842_v52  ;;  %v2698_v43 = vpack.c.bf16 %v2179_v38, %v2172_v46  ;;  %v1418_v8 = vpop.eup %1417 }
 0x2e7   : > { %v858_v12 = vmul.f32 1.442695, %v2697_v61  ;;  %v884_v26 = vadd.f32 %v2307_v55, %v883_v62  ;;  %1437 = vpow2.f32 %v846_v58  ;;  %v905_v53 = vadd.f32 %v1400_v40, %v904_v20  ;;  %v1420_v41 = vpop.eup %1419 }
 0x2e8   : > { %973 = vmatpush1.bf16.msra.mxu0 %v2698_v43  ;;  %v951_v22 = vpack.c.bf16 %v1416_v25, %v1414_v2  ;;  %1439 = vpow2.f32 %v850_v54  ;;  %v1422_v45 = vpop.eup %1421  ;;  %v953_v10 = vpack.c.bf16 %v1420_v41, %v1418_v8  ;;  %v2699_v38 = vpack.c.bf16 %v2194_v28, %v2187_v39 }
 0x2e9   : > { %974 = vmatprep.subr.bf16.mxu0 %v943_v32  ;;  %v885_v23 = vadd.f32 %v2315_v44, %v884_v26  ;;  %1441 = vpow2.f32 %v854_v16  ;;  %v906_v5 = vadd.f32 %v1402_v36, %v905_v53  ;;  %v1424_v52 = vpop.eup %1423  ;;  %v2700_v7 = vpack.c.bf16 %v2208_v35, %v2202_v47 }
 0x2ea   : > { %1443 = vpow2.f32 %v858_v12  ;;  %v1426_v46 = vpop.eup %1425  ;;  %v955_v32 = vpack.c.bf16 %v1424_v52, %v1422_v45  ;;  %v2702_v26 = vpack.c.bf16 %v2233_v17, %v2227_v57  ;;  %v2706_v57 = vpack.c.bf16 %v2272_v0, %v2263_v6 }
 0x2eb   : > { %v886_v63 = vadd.f32 %v2322_v1, %v885_v23  ;;  %v907_v40 = vadd.f32 %v1404_v48, %v906_v5  ;;  %v1428_v34 = vpop.eup %1427  ;;  %v2703_v23 = vld [vmem:[#allocation13_spill] sm:$0xff]  ;;  %v2709_v6 = vpack.c.bf16 %v2322_v1, %v2315_v44 }
 0x2ec   : > { %975 = vmatpush1.bf16.msra.mxu0 %v2699_v38  ;;  %v1430_v58 = vpop.eup %1429  ;;  %v957_v11 = vpack.c.bf16 %v1428_v34, %v1426_v46 }
 0x2ed   : > { %976 = vmatprep.subr.bf16.mxu0 %v945_v37  ;;  %v887_v50 = vadd.f32 %v2330_v60, %v886_v63  ;;  %v908_v31 = vadd.f32 %v1406_v56, %v907_v40  ;;  %v1432_v36 = vpop.eup %1431  ;;  %v2701_v56 = vpack.c.bf16 %v2221_v24, %v2214_v51  ;;  %v2704_v51 = vpack.c.bf16 %v2244_v29, %v2703_v23  ;;  %v1452_v23 = vld [vmem:[%s1795_s11 + $0x18] sm:$0xff] }
 0x2ee   : > { %v959_v15 = vpack.c.bf16 %v1432_v36, %v1430_v58  ;;  %v2707_v29 = vpack.c.bf16 %v2292_v33, %v2283_v4  ;;  %v2710_v4 = vpack.c.bf16 %v2338_v9, %v2330_v60 }
 0x2ef   : > { %v1434_v54 = vpop.eup %1433  ;;  %v888_v28 = vadd.f32 %v2338_v9, %v887_v50  ;;  %v909_v39 = vadd.f32 %v1408_v59, %v908_v31  ;;  %v1316_v9 = vld [vmem:[%s2545_s2] sm:$0xff]  }
 0x2f0   : > { %977 = vmatpush1.bf16.msra.mxu0 %v2700_v7  ;;  %v1436_v48 = vpop.eup %1435 }
 0x2f1   : > { %978 = vmatprep.subr.bf16.mxu0 %v947_v27  ;;  %v1438_v37 = vpop.eup %1437  ;;  %v889_v16 = vadd.f32 %v2343_v21, %v888_v28  ;;  %v910_v62 = vadd.f32 %v1410_v3, %v909_v39  ;;  %v961_v20 = vpack.c.bf16 %v1436_v48, %v1434_v54  ;;  %v1071_v39 = vstv %s1070_s28 }
 0x2f2   : > { %v1440_v49 = vpop.eup %1439 }
 0x2f3   : > { %v1442_v61 = vpop.eup %1441  ;;  %v890_v35 = vadd.f32 %v2351_v18, %v889_v16  ;;  %v911_v47 = vadd.f32 %v1412_v19, %v910_v62  ;;  %v963_v12 = vpack.c.bf16 %v1440_v49, %v1438_v37  ;;  %v2705_v19 = vpack.c.bf16 %v2255_v13, %v2249_v30 }
 0x2f4   : > { %979 = vmatpush1.bf16.msra.mxu0 %v2701_v56  ;;  %v1444_v59 = vpop.eup %1443  ;;  %v2708_v30 = vpack.c.bf16 %v2307_v55, %v2300_v14  ;;  %v2711_v14 = vpack.c.bf16 %v2351_v18, %v2343_v21  ;;  %v2712_v55 = vld [vmem:[#allocation12_spill] sm:$0xff] }
 0x2f5   : > { %980 = vmatprep.subr.bf16.mxu0 %v949_v42  ;;  %v912_v27 = vadd.f32 %v1414_v2, %v911_v47  ;;  %v965_v43 = vpack.c.bf16 %v1444_v59, %v1442_v61  ;;  %v891_v21 = vrot.slane %v890_v35, 4  ;;  %v1449_v47 = vld [vmem:[%s1795_s11] sm:$0xff] }
 0x2f7   : > { %v913_v3 = vadd.f32 %v1416_v25, %v912_v27  ;;  %v892_v18 = vadd.f32 %v891_v21, %v890_v35  ;;  %v1450_v27 = vld [vmem:[%s1795_s11 + $0x8] sm:$0xff] }
 0x2f8   : > { %981 = vmatpush1.bf16.msra.mxu0 %v2702_v26 }
 0x2f9   : > { %982 = vmatprep.subr.bf16.mxu0 %v951_v22  ;;  %v914_v53 = vadd.f32 %v1418_v8, %v913_v3  ;;  %v1451_v3 = vld [vmem:[%s1795_s11 + $0x10] sm:$0xff] }
 0x2fb   : > { %v915_v24 = vadd.f32 %v1420_v41, %v914_v53 }
 0x2fc   : > { %983 = vmatpush1.bf16.msra.mxu0 %v2704_v51 }
 0x2fd   : > { %984 = vmatprep.subr.bf16.mxu0 %v953_v10  ;;  %v916_v5 = vadd.f32 %v1422_v45, %v915_v24  ;;  %v2713_v10 = vmov 0  }
 0x2ff   : > { %v917_v2 = vadd.f32 %v1424_v52, %v916_v5 }
 0x300   : > { %985 = vmatpush1.bf16.msra.mxu0 %v2705_v19 }
 0x301   : > { %986 = vmatprep.subr.bf16.mxu0 %v955_v32  ;;  %v918_v42 = vadd.f32 %v1426_v46, %v917_v2  ;;  %v893_v32 = vrot.slane %v892_v18, 2 }
 0x303   : > { %v919_v17 = vadd.f32 %v1428_v34, %v918_v42 }
 0x304   : > { %987 = vmatpush1.bf16.msra.mxu0 %v2706_v57 }
 0x305   : > { %988 = vmatprep.subr.bf16.mxu0 %v957_v11  ;;  %v920_v25 = vadd.f32 %v1430_v58, %v919_v17  ;;  %v894_v58 = vadd.f32 %v893_v32, %v892_v18 }
 0x307   : > { %v921_v8 = vadd.f32 %v1432_v36, %v920_v25  ;;  %v895_v31 = vrot.slane %v894_v58, 1 }
 0x308   : > { %989 = vmatpush1.bf16.msra.mxu0 %v2707_v29 }
 0x309   : > { %990 = vmatprep.subr.bf16.mxu0 %v959_v15  ;;  %v922_v22 = vadd.f32 %v1434_v54, %v921_v8  ;;  %v896_v36 = vadd.f32 %v895_v31, %v894_v58 }
 0x30b   : > { %v923_v13 = vadd.f32 %v1436_v48, %v922_v22  ;;  %1445 = vrcp.f32 %v896_v36 }
 0x30c   : > { %991 = vmatpush1.bf16.msra.mxu0 %v2708_v30 }
 0x30d   : > { %992 = vmatprep.subr.bf16.mxu0 %v961_v20  ;;  %v924_v41 = vadd.f32 %v1438_v37, %v923_v13 }
 0x30f   : > { %v925_v0 = vadd.f32 %v1440_v49, %v924_v41 }
 0x310   : > { %993 = vmatpush1.bf16.msra.mxu0 %v2709_v6 }
 0x311   : > { %994 = vmatprep.subr.bf16.mxu0 %v963_v12  ;;  %v926_v45 = vadd.f32 %v1442_v61, %v925_v0 }
 0x313   : > { %v927_v33 = vadd.f32 %v1444_v59, %v926_v45 }
 0x314   : > { %995 = vmatpush1.bf16.msra.mxu0 %v2710_v4 }
 0x315   : > { %996 = vmatprep.subr.bf16.mxu0 %v965_v43  ;;  %v928_v60 = vrot.slane %v927_v33, 4  ;;  %v1446_v54 = vpop.eup %1445 }
 0x317   : > { %v929_v40 = vadd.f32 %v928_v60, %v927_v33 }
 0x318   : > { %997 = vmatpush1.bf16.msra.mxu0 %v2711_v14 }
 0x319   : > { %v930_v34 = vrot.slane %v929_v40, 2 }
 0x31b   : > { %999 = vmatmul.mubr.bf16.vlgmr.msra.gmra.mrb[4].mxu0 %v2712_v55  ;;  %v931_v50 = vadd.f32 %v930_v34, %v929_v40 }
 0x31c   : > { %1053 = vmatprep.mubr.bf16.mxu0 %v2713_v10 }
 0x31d   : > { %v932_v11 = vrot.slane %v931_v50, 1 }
 0x31f   : > { %v933_v7 = vadd.f32 %v932_v11, %v931_v50 }
 0x321   : > { %1447 = vrcp.f32 %v933_v7 }
 0x32b   : > { %v1448_v15 = vpop.eup %1447 }
 0x3ee   : > { %v1000_v52 = vpop.f32.mrb[4].mxu0 }
 0x3ef   : > { %v1002_v1 = vpop.f32.mrb[5].mxu0 }
 0x3f0   : > { %v1004_v44 = vpop.f32.mrb[6].mxu0 }
 0x3f1   : > { %v1011_v38 = vpack.c.bf16 %v1004_v44, %v1000_v52  ;;  %v1006_v46 = vpop.f32.mrb[7].mxu0 }
 0x3f2   : > { %v1012_v63 = vpack.c.bf16 %v1006_v46, %v1002_v1 }
 0x3f4   : > { %1021 = vmatprep.subr.bf16.mxu0 %v1012_v63 }
 0x3f5   : > { %1022 = vmatpush1.bf16.msra.mxu0 %v1011_v38 }
 0x3f8   : > { %1227 = vmatmul.mubr.msk.bf16.vlgmr.msra.gmra.mrb[8].mxu0 %vm272_vm0, %v1316_v9 }
 0x4cb   : > { %v1055_v28 = vpop.f32.mrb[8].mxu0 }
 0x4cc   : > { %v1066_v48 = vmul.f32 %v1446_v54, %v1055_v28  ;;  %v1057_v37 = vpop.f32.mrb[9].mxu0 }
 0x4cd   : > { %v1067_v16 = vmul.f32 %v1448_v15, %v1057_v37  ;;  %v1059_v62 = vpop.f32.mrb[10].mxu0 }
 0x4ce   : > { %v1072_v20 = vmul.f32 %v1071_v39, %v1066_v48  ;;  %v1068_v49 = vmul.f32 %v1446_v54, %v1059_v62  ;;  %v1061_v56 = vpop.f32.mrb[11].mxu0 }
 0x4cf   : > { %v1073_v61 = vmul.f32 %v1071_v39, %v1067_v16  ;;  %v1069_v35 = vmul.f32 %v1448_v15, %v1061_v56 }
 0x4d0   : > { %v1076_v12 = vadd.f32 %v1449_v47, %v1072_v20  ;;  %v1074_v59 = vmul.f32 %v1071_v39, %v1068_v49 }
 0x4d1   : > { %v1077_v43 = vadd.f32 %v1450_v27, %v1073_v61  ;;  %v1075_v26 = vmul.f32 %v1071_v39, %v1069_v35 }
 0x4d2   : > { %1080 = vst [vmem:[%s245_s14] sm:$0xff] %v1076_v12  ;;  %v1078_v53 = vadd.f32 %v1451_v3, %v1074_v59 }
 0x4d3   : > { %1081 = vst [vmem:[%s245_s14 + $0x8] sm:$0xff] %v1077_v43  ;;  %v1079_v51 = vadd.f32 %v1452_v23, %v1075_v26 }
 0x4d4   : > { %1082 = vst [vmem:[%s245_s14 + $0x10] sm:$0xff] %v1078_v53 }
 0x4d5   : > { %1083 = vst [vmem:[%s245_s14 + $0x18] sm:$0xff] %v1079_v51 }
 0x4d6   : > { %1524 = shalt.err (!%p1521_p5)
}
 0x4d7   : > { %s1525_s7 = scalar_lea.hbm %s2493_s20, 512  ;;  %s1529_s24 = scalar_lea.hbm %s2547_s4, 1024 }
 0x4d8   : > { %p1526_p9 = scmp.ne.s32.totalorder %s2493_s20, %s1525_s7  ;;  %p1530_p3 = scmp.lt.u32.totalorder %s2493_s20, %s2547_s4 }
 0x4d9   : > { %p1531_p7 = scmp.lt.u32.totalorder %s1529_s24, %s1525_s7  ;;  %p1533_p4 = scmp.lt.u32.totalorder %s1525_s7, %s2493_s20 }
 0x4da   : > { %p1527_p1 = pnand %p1526_p9, %p1733_p10 }
 0x4db   : > { %p1532_p13 = por %p1531_p7, %p1530_p3 }
 0x4dc   : > { %p1528_p2 = pneg %p1527_p1 }
 0x4dd   : > { %p1534_p6 = por %p1533_p4, %p1532_p13 }
 0x4df   : > { %p1535_p8 = pnand %p1534_p6, %p1528_p2 }
 0x4e1   : > { %1538 = shalt.err (!%p1535_p8)
}
 0x4e2   : > { %s1607_s14 = smov 256   ;;  %s1608_s16 = smov 16  }
 0x4e3   : > { %1241 = dma.vmem_to_hbm [thread:$0]  (%p1733_p10), %s2486_s15, 512, %s2493_s20, %s1085_s12, %s1607_s14, %s1607_s14, %s1608_s16  }
 0x4e4 PF: > { %s1115_s3 = sand.u32 1, %s1577_s17   ;;  %p2714_p12 = scmp.ne.s32.totalorder %s2599_s27, 0 }
 0x4e5   : > { %p2715_p11 = scmp.ge.s32.totalorder %s1597_s22, 2  ;;  %s1116_s30 = scalar_lea.sflag [#allocation5], %s1115_s3 }
 0x4e7   : > { %p1252_p0 = pnand %p2715_p11, %p2714_p12 }
 0x4e9   : > { %1572 = dma.done.wait (!%p1252_p0), %s1116_s30, 512  }
 0x4ea   : > { %1574 = vsyncadd (!%p1252_p0), %s1116_s30, 4294966784  ;;  %s22_s22 = sadd.s32 1, %s1597_s22   ;;  %s2716_s17 = smov %s1581_s18 }
 0x4eb   : > { %p19_p5 = scmp.ge.s32.totalorder %s22_s22, 4   ;;  %s2717_s18 = smov %s1585_s19 }
 0x4ec   : > { %s2718_s19 = smov %s1742_s10  ;;  %s2719_s20 = smov %s1593_s21 }
 0x4ed   : > { %s2720_s21 = smov %s2722_s6  ;;  %21 = sbr.rel (!%p19_p5) target bundleno = 9 (0x9), region = 86 }
 0x4f4   :  { %1121 = vsyncpa [#allocation4], 1 }
 0x4f5   :  { %1123 = vsyncpa [#allocation4 + $0x1], 1 }
 0x4f6   :  { %1124 = vsyncpa [#allocation7], 1 }
 0x4f7   :  { %1125 = vsyncpa [#allocation5], 1 }
 0x4f8   :  { %1127 = vsyncpa [#allocation5 + $0x1], 1 }

</bundles_post_ra>
